<compile_context>
chip_gen: v6e
topology: v6e:2x2x1
jax: 0.10.0
libtpu: 0.0.40
codegen_flags: <defaults>
</compile_context>

<pallas_src>
import functools

import jax
import jax.numpy as jnp
from jax import lax
from jax.experimental import pallas as pl
from jax.experimental.pallas import tpu as pltpu


# ----------------------------------------------------------------------------
# Parameter preparation (run once at parameter-load time, not per call)
# ----------------------------------------------------------------------------
def prepare_qkv_weights(wq, wk, wv, compute_dtype=jnp.bfloat16):
    """Stack (d_in, d_out) weights into (3, d_in, d_out) with the 1/sqrt(d_out)
    softmax scale folded into Wq, cast to the MXU compute dtype."""
    d_out = wq.shape[1]
    scale = 1.0 / jnp.sqrt(jnp.asarray(d_out, jnp.float32))
    w = jnp.stack([wq.astype(jnp.float32) * scale,
                   wk.astype(jnp.float32),
                   wv.astype(jnp.float32)], axis=0)
    return w.astype(compute_dtype)


# ----------------------------------------------------------------------------
# Kernel 1: QKV projection (stacked weights, lane-aligned outputs)
# ----------------------------------------------------------------------------
def _qkv_proj_kernel(x_ref, w_ref, q_ref, k_ref, v_ref, *, compute_dtype):
    # x_ref: (bm, d_in); w_ref: (3, d_in, d_out); q/k/v_ref: (bm, d_out)
    x = x_ref[...].astype(compute_dtype)
    q_ref[...] = jnp.dot(x, w_ref[0],
                         preferred_element_type=jnp.float32).astype(q_ref.dtype)
    k_ref[...] = jnp.dot(x, w_ref[1],
                         preferred_element_type=jnp.float32).astype(k_ref.dtype)
    v_ref[...] = jnp.dot(x, w_ref[2],
                         preferred_element_type=jnp.float32).astype(v_ref.dtype)


# ----------------------------------------------------------------------------
# Kernel 2: flash-attention forward over a precomputed lower-triangular schedule
# ----------------------------------------------------------------------------
def _flash_causal_kernel(qi_ref, ki_ref, q_ref, k_ref, v_ref, o_ref,
                         m_sc, l_sc, acc_sc, *, block_q, block_k):
    step = pl.program_id(1)
    qi = qi_ref[step]          # q-block index for this step (SMEM scalar)
    ki = ki_ref[step]          # kv-block index for this step (SMEM scalar)

    @pl.when(ki == 0)          # first kv step of each q tile
    def _init():
        m_sc[...] = jnp.full_like(m_sc, -jnp.inf)
        l_sc[...] = jnp.zeros_like(l_sc)
        acc_sc[...] = jnp.zeros_like(acc_sc)

    q = q_ref[0]               # (bq, d); 1/sqrt(d_out) already folded into Wq
    k = k_ref[0]               # (bk, d)
    v = v_ref[0]               # (bk, d)

    def online_update(s):
        # Online softmax: all statistics and accumulation in f32.
        m_prev = m_sc[...]                                         # (bq, 1)
        m_new = jnp.maximum(m_prev, jnp.max(s, axis=-1, keepdims=True))
        alpha = jnp.exp(m_prev - m_new)
        p = jnp.exp(s - m_new)                                     # (bq, bk)
        l_sc[...] = alpha * l_sc[...] + jnp.sum(p, axis=-1, keepdims=True)
        acc_sc[...] = alpha * acc_sc[...] + jnp.dot(
            p.astype(v.dtype), v, preferred_element_type=jnp.float32)
        m_sc[...] = m_new

    # Only blocks that straddle the diagonal need the mask; fully-allowed
    # blocks skip the iota/compare/select work entirely.
    needs_mask = (ki + 1) * block_k - 1 > qi * block_q

    @pl.when(jnp.logical_not(needs_mask))
    def _full_block():
        # q @ k^T without an explicit transpose of k.
        s = lax.dot_general(q, k, (((1,), (1,)), ((), ())),
                            preferred_element_type=jnp.float32)    # (bq, bk)
        online_update(s)

    @pl.when(needs_mask)
    def _diag_block():
        s = lax.dot_general(q, k, (((1,), (1,)), ((), ())),
                            preferred_element_type=jnp.float32)
        row = qi * block_q + lax.broadcasted_iota(jnp.int32, (block_q, block_k), 0)
        col = ki * block_k + lax.broadcasted_iota(jnp.int32, (block_q, block_k), 1)
        s = jnp.where(col > row, -jnp.inf, s)
        online_update(s)

    # Last kv block for this q tile -> normalize once and store.
    is_last = ki == ((qi + 1) * block_q - 1) // block_k

    @pl.when(is_last)
    def _finalize():
        inv_l = pl.reciprocal(l_sc[...], approx=False)   # once per q tile
        o_ref[0] = (acc_sc[...] * inv_l).astype(o_ref.dtype)


# ----------------------------------------------------------------------------
# Wrapper helpers
# ----------------------------------------------------------------------------
def _pick_tile(n, max_tile):
    for t in (1024, 512, 256, 128, 64, 32, 16, 8):
        if t <= max_tile and n % t == 0:
            return t
    return n


def _hw_config():
    """Per-generation VMEM budget and default tile caps.

    v5e/v6e have 128 MiB VMEM per TensorCore; v7x has 64 MiB per TC, so stay
    conservative there (and whenever the query fails)."""
    vmem_bytes = None
    try:
        vmem_bytes = pltpu.get_tpu_info().vmem_capacity_bytes
    except Exception:
        pass
    if vmem_bytes is not None and vmem_bytes >= 100 * 1024 * 1024:
        return 96 * 1024 * 1024, 128, 512     # vmem_limit, max block_q, max block_k
    return 48 * 1024 * 1024, 128, 256


def _build_schedule(T, block_q, block_k):
    """(qi, ki) pairs for every kv block that is not fully masked."""
    num_q = T // block_q
    qi_list, ki_list = [], []
    for qi in range(num_q):
        limit = (qi + 1) * block_q            # exclusive allowed-column limit
        num_k = -(-limit // block_k)          # ceil div
        for ki in range(num_k):
            qi_list.append(qi)
            ki_list.append(ki)
    return (jnp.asarray(qi_list, dtype=jnp.int32),
            jnp.asarray(ki_list, dtype=jnp.int32))


# ----------------------------------------------------------------------------
# Wrapper
# ----------------------------------------------------------------------------
def causal_attention(x, w_stacked, *, block_q=None, block_k=None,
                     block_proj=None, vmem_limit_bytes=None):
    """Eval-mode CausalAttention forward.

    x: (B, T, d_in); w_stacked: (3, d_in, d_out) from prepare_qkv_weights
    (scale folded into Wq, cast to the MXU compute dtype).
    Returns (B, T, d_out) in x.dtype.
    """
    B, T, d_in = x.shape
    assert w_stacked.ndim == 3 and w_stacked.shape[0] == 3
    assert w_stacked.shape[1] == d_in
    d_out = w_stacked.shape[2]
    compute_dtype = w_stacked.dtype
    assert T % 8 == 0, "sequence length must be a multiple of 8 (sublane)"

    vmem_default, max_bq, max_bk = _hw_config()
    if vmem_limit_bytes is None:
        vmem_limit_bytes = vmem_default
    if block_q is None:
        block_q = _pick_tile(T, max_bq)
    if block_k is None:
        block_k = _pick_tile(T, max_bk)
    if block_proj is None:
        block_proj = _pick_tile(B * T, 512)
    assert T % block_q == 0 and T % block_k == 0
    assert (B * T) % block_proj == 0

    itemsize = jnp.dtype(compute_dtype).itemsize

    # ---------------- Kernel 1: QKV projection ----------------
    x2d = x.reshape(B * T, d_in)
    n_rows = B * T
    proj_cost = pl.CostEstimate(
        flops=2 * n_rows * d_in * 3 * d_out,
        transcendentals=0,
        bytes_accessed=(x2d.dtype.itemsize * n_rows * d_in
                        + itemsize * 3 * d_in * d_out
                        + itemsize * 3 * n_rows * d_out),
    )
    qkv_shape = jax.ShapeDtypeStruct((n_rows, d_out), compute_dtype)
    q2, k2, v2 = pl.pallas_call(
        functools.partial(_qkv_proj_kernel, compute_dtype=compute_dtype),
        out_shape=(qkv_shape, qkv_shape, qkv_shape),
        grid_spec=pltpu.PrefetchScalarGridSpec(
            num_scalar_prefetch=0,
            grid=(n_rows // block_proj,),
            in_specs=[
                pl.BlockSpec((block_proj, d_in), lambda i: (i, 0)),
                pl.BlockSpec((3, d_in, d_out), lambda i: (0, 0, 0)),
            ],
            out_specs=[
                pl.BlockSpec((block_proj, d_out), lambda i: (i, 0)),
                pl.BlockSpec((block_proj, d_out), lambda i: (i, 0)),
                pl.BlockSpec((block_proj, d_out), lambda i: (i, 0)),
            ],
        ),
        compiler_params=pltpu.CompilerParams(
            dimension_semantics=("parallel",),
            vmem_limit_bytes=vmem_limit_bytes),
        cost_estimate=proj_cost,
    )(x2d, w_stacked)

    q = q2.reshape(B, T, d_out)
    k = k2.reshape(B, T, d_out)
    v = v2.reshape(B, T, d_out)

    # ---------------- Kernel 2: flash attention ----------------
    qi_map, ki_map = _build_schedule(T, block_q, block_k)
    num_steps = int(qi_map.shape[0])

    attn_cost = pl.CostEstimate(
        flops=4 * B * num_steps * block_q * block_k * d_out,       # QK^T + PV
        transcendentals=B * num_steps * block_q * block_k,          # exp
        bytes_accessed=(itemsize * B * T * d_out                    # q (once)
                        + 2 * itemsize * B * num_steps * block_k * d_out  # k,v re-reads
                        + x.dtype.itemsize * B * T * d_out),        # output
    )

    kernel = functools.partial(_flash_causal_kernel,
                               block_q=block_q, block_k=block_k)

    # NOTE: if profiling shows exposed kv DMA, add pipeline_mode=pl.Buffered(3)
    # on the k/v BlockSpecs (k/v tiles are tiny).
    return pl.pallas_call(
        kernel,
        out_shape=jax.ShapeDtypeStruct((B, T, d_out), x.dtype),
        grid_spec=pltpu.PrefetchScalarGridSpec(
            num_scalar_prefetch=2,           # qi_map, ki_map
            grid=(B, num_steps),
            in_specs=[
                pl.BlockSpec((1, block_q, d_out),
                             lambda b, s, qm, km: (b, qm[s], 0)),
                pl.BlockSpec((1, block_k, d_out),
                             lambda b, s, qm, km: (b, km[s], 0)),
                pl.BlockSpec((1, block_k, d_out),
                             lambda b, s, qm, km: (b, km[s], 0)),
            ],
            out_specs=pl.BlockSpec((1, block_q, d_out),
                                   lambda b, s, qm, km: (b, qm[s], 0)),
            scratch_shapes=[
                pltpu.VMEM((block_q, 1), jnp.float32),       # m
                pltpu.VMEM((block_q, 1), jnp.float32),       # l
                pltpu.VMEM((block_q, d_out), jnp.float32),   # acc
            ],
        ),
        compiler_params=pltpu.CompilerParams(
            dimension_semantics=("parallel", "arbitrary"),
            vmem_limit_bytes=vmem_limit_bytes),
        cost_estimate=attn_cost,
    )(qi_map, ki_map, q, k, v)


# ----------------------------------------------------------------------------
# Pure-JAX reference (matches the PyTorch forward in eval mode)
# ----------------------------------------------------------------------------
def causal_attention_ref(x, wq, wk, wv):
    q = x @ wq
    k = x @ wk
    v = x @ wv
    d_out = q.shape[-1]
    scores = jnp.einsum("btd,bsd->bts", q, k)
    T = x.shape[1]
    mask = jnp.triu(jnp.ones((T, T), dtype=bool), k=1)
    scores = jnp.where(mask[None, :, :], -jnp.inf, scores)
    attn = jax.nn.softmax(scores / jnp.sqrt(jnp.float32(d_out)), axis=-1)
    return attn @ v


if __name__ == "__main__":
    key = jax.random.PRNGKey(0)
    kx, kq, kk, kv = jax.random.split(key, 4)

    d_in, d_out = 32, 32
    # Deterministic "nn.Linear"-style weights (bias=False), stored as (d_in, d_out).
    wq = jax.random.uniform(kq, (d_in, d_out), minval=-1.0, maxval=1.0,
                            dtype=jnp.float32) / jnp.sqrt(jnp.float32(d_in))
    wk = jax.random.uniform(kk, (d_in, d_out), minval=-1.0, maxval=1.0,
                            dtype=jnp.float32) / jnp.sqrt(jnp.float32(d_in))
    wv = jax.random.uniform(kv, (d_in, d_out), minval=-1.0, maxval=1.0,
                            dtype=jnp.float32) / jnp.sqrt(jnp.float32(d_in))

    # Case 1: module-scale small shapes (B=2, context_length T=8), f32 MXU path.
    B, T = 2, 8
    x = jax.random.normal(kx, (B, T, d_in), dtype=jnp.float32)
    w_f32 = prepare_qkv_weights(wq, wk, wv, compute_dtype=jnp.float32)
    out = jax.block_until_ready(causal_attention(x, w_f32))
    ref = causal_attention_ref(x, wq, wk, wv)
    assert out.shape == (B, T, d_out)
    assert jnp.allclose(out, ref, atol=1e-4, rtol=1e-4), "mismatch vs reference (T=8, f32)"

    # Case 2: multi-tile sequence, bf16 MXU path; exercises the triangular
    # (qi, ki) schedule, the online-softmax merge and the diagonal-only mask.
    B2, T2 = 2, 256
    x2 = jax.random.normal(jax.random.PRNGKey(1), (B2, T2, d_in), dtype=jnp.float32)
    w_bf16 = prepare_qkv_weights(wq, wk, wv, compute_dtype=jnp.bfloat16)
    out2 = jax.block_until_ready(
        causal_attention(x2, w_bf16, block_q=128, block_k=128, block_proj=128))
    ref2 = causal_attention_ref(x2, wq, wk, wv)
    assert out2.shape == (B2, T2, d_out)
    assert jnp.allclose(out2, ref2, atol=2e-2, rtol=2e-2), "mismatch vs reference (T=256, bf16)"

    print("KERNEL_OK")
</pallas_src>

<mosaic_0001>
module attributes {stable_mosaic.version = 11 : i64} {
  func.func @_qkv_proj_kernel(%arg0: i32, %arg1: memref<16x32xf32, #tpu.memory_space<vmem>>, %arg2: memref<3x32x32xf32, #tpu.memory_space<vmem>>, %arg3: memref<16x32xf32, #tpu.memory_space<vmem>>, %arg4: memref<16x32xf32, #tpu.memory_space<vmem>>, %arg5: memref<16x32xf32, #tpu.memory_space<vmem>>) attributes {dimension_semantics = [#tpu.dimension_semantics<parallel>], iteration_bounds = array<i64: 1>, scalar_prefetch = 0 : i64, scratch_operands = 0 : i64, tpu.core_type = #tpu.core_type<tc>, window_params = [{transform_indices = @transform_0, window_bounds = array<i64: 16, 32>}, {pipeline_mode = #tpu.pipeline_mode<synchronous>, transform_indices = @transform_1, window_bounds = array<i64: 3, 32, 32>}, {transform_indices = @transform_2, window_bounds = array<i64: 16, 32>}, {transform_indices = @transform_3, window_bounds = array<i64: 16, 32>}, {transform_indices = @transform_4, window_bounds = array<i64: 16, 32>}]} {
    %c0 = arith.constant 0 : index
    %c0_0 = arith.constant 0 : index
    %0 = vector.load %arg1[%c0, %c0_0] : memref<16x32xf32, #tpu.memory_space<vmem>>, vector<16x32xf32>
    %c0_1 = arith.constant 0 : index
    %c0_2 = arith.constant 0 : index
    %c0_3 = arith.constant 0 : index
    %1 = vector.load %arg2[%c0_1, %c0_2, %c0_3] : memref<3x32x32xf32, #tpu.memory_space<vmem>>, vector<1x32x32xf32>
    %2 = vector.shape_cast %1 : vector<1x32x32xf32> to vector<32x32xf32>
    %cst = arith.constant dense<0.000000e+00> : vector<16x32xf32>
    %3 = tpu.matmul %0, %2, %cst {dimension_numbers = #tpu.dot_dimension_numbers<[1], [0], [0], [1], [0, 0, 1, 1], [], []>} : vector<16x32xf32>, vector<32x32xf32>, vector<16x32xf32> -> vector<16x32xf32>
    %c0_4 = arith.constant 0 : index
    %c0_5 = arith.constant 0 : index
    %4 = vector.load %arg3[%c0_4, %c0_5] : memref<16x32xf32, #tpu.memory_space<vmem>>, vector<16x32xf32>
    tpu.vector_store %arg3[%c0_4, %c0_5], %3 {strides = array<i32>} : memref<16x32xf32, #tpu.memory_space<vmem>>, vector<16x32xf32>,
    %c1 = arith.constant 1 : index
    %c0_6 = arith.constant 0 : index
    %c0_7 = arith.constant 0 : index
    %5 = vector.load %arg2[%c1, %c0_6, %c0_7] : memref<3x32x32xf32, #tpu.memory_space<vmem>>, vector<1x32x32xf32>
    %6 = vector.shape_cast %5 : vector<1x32x32xf32> to vector<32x32xf32>
    %cst_8 = arith.constant dense<0.000000e+00> : vector<16x32xf32>
    %7 = tpu.matmul %0, %6, %cst_8 {dimension_numbers = #tpu.dot_dimension_numbers<[1], [0], [0], [1], [0, 0, 1, 1], [], []>} : vector<16x32xf32>, vector<32x32xf32>, vector<16x32xf32> -> vector<16x32xf32>
    %c0_9 = arith.constant 0 : index
    %c0_10 = arith.constant 0 : index
    %8 = vector.load %arg4[%c0_9, %c0_10] : memref<16x32xf32, #tpu.memory_space<vmem>>, vector<16x32xf32>
    tpu.vector_store %arg4[%c0_9, %c0_10], %7 {strides = array<i32>} : memref<16x32xf32, #tpu.memory_space<vmem>>, vector<16x32xf32>,
    %c2 = arith.constant 2 : index
    %c0_11 = arith.constant 0 : index
    %c0_12 = arith.constant 0 : index
    %9 = vector.load %arg2[%c2, %c0_11, %c0_12] : memref<3x32x32xf32, #tpu.memory_space<vmem>>, vector<1x32x32xf32>
    %10 = vector.shape_cast %9 : vector<1x32x32xf32> to vector<32x32xf32>
    %cst_13 = arith.constant dense<0.000000e+00> : vector<16x32xf32>
    %11 = tpu.matmul %0, %10, %cst_13 {dimension_numbers = #tpu.dot_dimension_numbers<[1], [0], [0], [1], [0, 0, 1, 1], [], []>} : vector<16x32xf32>, vector<32x32xf32>, vector<16x32xf32> -> vector<16x32xf32>
    %c0_14 = arith.constant 0 : index
    %c0_15 = arith.constant 0 : index
    %12 = vector.load %arg5[%c0_14, %c0_15] : memref<16x32xf32, #tpu.memory_space<vmem>>, vector<16x32xf32>
    tpu.vector_store %arg5[%c0_14, %c0_15], %11 {strides = array<i32>} : memref<16x32xf32, #tpu.memory_space<vmem>>, vector<16x32xf32>,
    return
  }
  func.func @transform_0(%arg0: i32) -> (i32, i32) {
    %c0_i32 = arith.constant 0 : i32
    %c0_i32_0 = arith.constant 0 : i32
    return %arg0, %c0_i32 : i32, i32
  }
  func.func @transform_1(%arg0: i32) -> (i32, i32, i32) {
    %c0_i32 = arith.constant 0 : i32
    %c0_i32_0 = arith.constant 0 : i32
    %c0_i32_1 = arith.constant 0 : i32
    %c0_i32_2 = arith.constant 0 : i32
    return %c0_i32, %c0_i32_0, %c0_i32_1 : i32, i32, i32
  }
  func.func @transform_2(%arg0: i32) -> (i32, i32) {
    %c0_i32 = arith.constant 0 : i32
    %c0_i32_0 = arith.constant 0 : i32
    return %arg0, %c0_i32 : i32, i32
  }
  func.func @transform_3(%arg0: i32) -> (i32, i32) {
    %c0_i32 = arith.constant 0 : i32
    %c0_i32_0 = arith.constant 0 : i32
    return %arg0, %c0_i32 : i32, i32
  }
  func.func @transform_4(%arg0: i32) -> (i32, i32) {
    %c0_i32 = arith.constant 0 : i32
    %c0_i32_0 = arith.constant 0 : i32
    return %arg0, %c0_i32 : i32, i32
  }
}

</mosaic_0001>

<bundles_post_ra>
// kernel: tpu_custom_call.1
= control target key start
LH: loop header
LB: loop body
LE: loop exit
PB: predicated region body
PF: predicated region fallthrough
CT: control target
= control target key end

     0   :  { %10 = vsyncpa [#allocation3], 0  ;;  %s593_s0 = inlined_call_operand.hbm [shape: f32[16,32], index: 0, kind: input, shape index: {}]   ;;  %s594_s1 = inlined_call_operand.hbm [shape: f32[3,32,32], index: 1, kind: input, shape index: {}]   ;;  %s595_s2 = inlined_call_operand.hbm [shape: f32[16,32], index: 2, kind: output, shape index: {0}]   ;;  %s596_s3 = inlined_call_operand.hbm [shape: f32[16,32], index: 3, kind: output, shape index: {1}]   ;;  %s597_s4 = inlined_call_operand.hbm [shape: f32[16,32], index: 4, kind: output, shape index: {2}]  }
   0x1   :  { %11 = vsyncpa [#allocation6], 0 }
   0x2   :  { %12 = vsyncpa [#allocation4], 0 }
   0x3   :  { %13 = vsyncpa [#allocation9], 0  ;;  %s519_s15 = smov [#allocation2]  }
   0x4   :  { %s19_s16 = sshll.u32 %s519_s15, 4  ;;  %s20_s16 = int_to_ptr.vmem [resolvable:$true] %s19_s16 }
   0x5   :  { %s419_s17 = scalar_lea.vmem %s20_s16, 256  ;;  %p424_p1 = scmp.lt.s32.totalorder %s20_s16, %s20_s16 }
   0x6   :  { %p420_p0 = scmp.ne.s32.totalorder %s20_s16, %s419_s17  ;;  %p425_p2 = scmp.lt.s32.totalorder %s419_s17, %s419_s17 }
   0x8   :  { %p426_p3 = por %p425_p2, %p424_p1 }
   0xa   :  { %p427_p4 = pnand %p426_p3, %p420_p0 }
   0xc   :  { %430 = shalt.err (!%p427_p4)
}
   0xd   :  { %s520_s18 = smov 128   ;;  %s521_s19 = smov 8  }
   0xe   :  { %25 = dma.hbm_to_vmem [thread:$0]  %s593_s0, 256, %s20_s16, [#allocation3], %s520_s18, %s520_s18, %s521_s19  }
   0xf   :  { %s522_s22 = smov [#allocation5]  }
  0x10   :  { %s31_s23 = sshll.u32 %s522_s22, 4  ;;  %s32_s23 = int_to_ptr.vmem [resolvable:$true] %s31_s23 }
  0x11   :  { %s439_s24 = scalar_lea.vmem %s32_s23, 1536  ;;  %p444_p6 = scmp.lt.s32.totalorder %s32_s23, %s32_s23 }
  0x12   :  { %p440_p5 = scmp.ne.s32.totalorder %s32_s23, %s439_s24  ;;  %p445_p7 = scmp.lt.s32.totalorder %s439_s24, %s439_s24 }
  0x14   :  { %p446_p8 = por %p445_p7, %p444_p6 }
  0x16   :  { %p447_p9 = pnand %p446_p8, %p440_p5 }
  0x18   :  { %450 = shalt.err (!%p447_p9)
}
  0x19   :  { %37 = dma.hbm_to_vmem [thread:$0]  %s594_s1, 1536, %s32_s23, [#allocation6], %s520_s18, %s520_s18, %s521_s19  }
  0x1a   :  { %511 = dma.done.wait [#allocation3], 256  }
  0x1b   :  { %512 = vsyncadd [#allocation3], 4294967040 }
  0x1c   :  { %513 = dma.done.wait [#allocation6], 1536  }
  0x1d   :  { %514 = vsyncadd [#allocation6], 4294965760  ;;  %v49_v0 = vld [vmem:[#allocation5 + $0x18] sm:$0xff]  ;;  %v48_v1 = vld [vmem:[#allocation5 + $0x10] sm:$0xff]  ;;  %vm50_vm0 = vcmask 261120   ;;  %s523_s0 = smov [#allocation7]  }
  0x1e   :  { %371 = vmatprep.subr.mxu0 %v49_v0  ;;  %v138_v2 = vld [vmem:[#allocation5 + $0x38] sm:$0xff]  ;;  %v44_v3 = vld [vmem:[#allocation2] sm:$0xff]  ;;  %v47_v4 = vld [vmem:[#allocation5 + $0x8] sm:$0xff]  ;;  %s303_s1 = sshll.u32 %s523_s0, 4  ;;  %s524_s27 = smov [#allocation8]   ;;  %s304_s1 = int_to_ptr.vmem [resolvable:$true] %s303_s1 }
  0x1f   :  { %372 = vmatpush3.msra.mxu0 %v49_v0  ;;  %382 = vmatprep.subr.mxu1 %v138_v2  ;;  %v137_v5 = vld [vmem:[#allocation5 + $0x30] sm:$0xff]  ;;  %v46_v6 = vld [vmem:[#allocation5] sm:$0xff]  ;;  %v136_v7 = vld [vmem:[#allocation5 + $0x28] sm:$0xff]  ;;  %s315_s28 = sshll.u32 %s524_s27, 4  ;;  %s451_s29 = scalar_lea.vmem %s304_s1, 256  ;;  %s316_s28 = int_to_ptr.vmem [resolvable:$true] %s315_s28 }
  0x20   :  { %373 = vmatprep.subr.mxu0 %v48_v1  ;;  %383 = vmatpush3.msra.mxu1 %v138_v2  ;;  %v45_v8 = vld [vmem:[#allocation2 + $0x8] sm:$0xff]  ;;  %v135_v10 = vld [vmem:[#allocation5 + $0x20] sm:$0xff]  ;;  %v219_v11 = vld [vmem:[#allocation5 + $0x50] sm:$0xff]  ;;  %p452_p10 = scmp.ne.s32.totalorder %s304_s1, %s451_s29  ;;  %p456_p11 = scmp.lt.s32.totalorder %s304_s1, %s304_s1 }
  0x21   :  { %374 = vmatpush3.msra.mxu0 %v48_v1  ;;  %379 = vmatprep.mubr.msk.f32.mxu0 %vm50_vm0, %v44_v3  ;;  %v220_v9 = vld [vmem:[#allocation5 + $0x58] sm:$0xff]  ;;  %v218_v12 = vld [vmem:[#allocation5 + $0x48] sm:$0xff]  ;;  %v217_v13 = vld [vmem:[#allocation5 + $0x40] sm:$0xff]  ;;  %p457_p12 = scmp.lt.s32.totalorder %s451_s29, %s451_s29 }
  0x22   :  { %375 = vmatprep.subr.mxu0 %v47_v4  ;;  %384 = vmatprep.subr.mxu1 %v137_v5 }
  0x23   :  { %376 = vmatpush3.msra.mxu0 %v47_v4  ;;  %385 = vmatpush3.msra.mxu1 %v137_v5  ;;  %p458_p13 = por %p457_p12, %p456_p11 }
  0x24   :  { %377 = vmatprep.subr.mxu0 %v46_v6  ;;  %386 = vmatprep.subr.mxu1 %v136_v7 }
  0x25   :  { %378 = vmatpush3.msra.mxu0 %v46_v6  ;;  %387 = vmatpush3.msra.mxu1 %v136_v7  ;;  %p459_p0 = pnand %p458_p13, %p452_p10 }
  0x26   :  { %380 = vmatmul.mubr.msk.f32.vlgmr.msra.gmra.mxu0 %vm50_vm0, %v45_v8  ;;  %393 = vmatprep.subr.mxu0 %v220_v9 }
  0x27   :  { %394 = vmatpush3.msra.mxu0 %v220_v9  ;;  %388 = vmatprep.subr.mxu1 %v135_v10 }
  0x28   :  { %395 = vmatprep.subr.mxu0 %v219_v11  ;;  %389 = vmatpush3.msra.mxu1 %v135_v10 }
  0x29   :  { %396 = vmatpush3.msra.mxu0 %v219_v11  ;;  %390 = vmatprep.mubr.msk.f32.mxu1 %vm50_vm0, %v44_v3 }
  0x2a   :  { %397 = vmatprep.subr.mxu0 %v218_v12  ;;  %391 = vmatmul.mubr.msk.f32.vlgmr.msra.gmra.mxu1 %vm50_vm0, %v45_v8 }
  0x2b   :  { %398 = vmatpush3.msra.mxu0 %v218_v12  ;;  %401 = vmatprep.mubr.msk.f32.mxu0 %vm50_vm0, %v44_v3 }
  0x2c   :  { %399 = vmatprep.subr.mxu0 %v217_v13 }
  0x2d   :  { %400 = vmatpush3.msra.mxu0 %v217_v13 }
  0x2e   :  { %402 = vmatmul.mubr.msk.f32.vlgmr.msra.gmra.mxu0 %vm50_vm0, %v45_v8 }
  0xe6   :  { %v381_v14 = vpop.f32.mrf.mxu0 }
  0xe7   :  { %133 = vst.msk [vmem:[#allocation7 + $0x8] sm:$0xff] %vm50_vm0, %v381_v14 }
  0xe8   :  { %v123_v15 = vpop.f32.mrf.mxu0 }
  0xe9   :  { %132 = vst.msk [vmem:[#allocation7] sm:$0xff] %vm50_vm0, %v123_v15 }
  0xea   :  { %v392_v16 = vpop.f32.mrf.mxu1 }
  0xeb   :  { %462 = shalt.err (!%p459_p0)
}
  0xec   :  { %309 = dma.vmem_to_hbm [thread:$0]  %s304_s1, 256, %s595_s2, [#allocation4], %s520_s18, %s520_s18, %s521_s19   ;;  %215 = vst.msk [vmem:[#allocation8 + $0x8] sm:$0xff] %vm50_vm0, %v392_v16  ;;  %v205_v17 = vpop.f32.mrf.mxu1 }
  0xed   :  { %s525_s6 = smov [#allocation10]   ;;  %214 = vst.msk [vmem:[#allocation8] sm:$0xff] %vm50_vm0, %v205_v17  ;;  %s471_s8 = scalar_lea.vmem %s316_s28, 256 }
  0xee   :  { %s327_s7 = sshll.u32 %s525_s6, 4  ;;  %v403_v18 = vpop.f32.mrf.mxu0  ;;  %p472_p1 = scmp.ne.s32.totalorder %s316_s28, %s471_s8  ;;  %s328_s7 = int_to_ptr.vmem [resolvable:$true] %s327_s7 }
  0xef   :  { %p476_p2 = scmp.lt.s32.totalorder %s316_s28, %s316_s28  ;;  %p477_p3 = scmp.lt.s32.totalorder %s471_s8, %s471_s8 }
  0xf1   :  { %p478_p4 = por %p477_p3, %p476_p2 }
  0xf3   :  { %p479_p5 = pnand %p478_p4, %p472_p1 }
  0xf5   :  { %482 = shalt.err (!%p479_p5)
}
  0xf6   :  { %321 = dma.vmem_to_hbm [thread:$0]  %s316_s28, 256, %s596_s3, [#allocation9], %s520_s18, %s520_s18, %s521_s19   ;;  %297 = vst.msk [vmem:[#allocation10 + $0x8] sm:$0xff] %vm50_vm0, %v403_v18  ;;  %v287_v19 = vpop.f32.mrf.mxu0 }
  0xf7   :  { %296 = vst.msk [vmem:[#allocation10] sm:$0xff] %vm50_vm0, %v287_v19  ;;  %s491_s10 = scalar_lea.vmem %s328_s7, 256  ;;  %p496_p7 = scmp.lt.s32.totalorder %s328_s7, %s328_s7 }
  0xf8   :  { %p492_p6 = scmp.ne.s32.totalorder %s328_s7, %s491_s10  ;;  %p497_p8 = scmp.lt.s32.totalorder %s491_s10, %s491_s10 }
  0xfa   :  { %p498_p9 = por %p497_p8, %p496_p7 }
  0xfc   :  { %p499_p10 = pnand %p498_p9, %p492_p6 }
  0xfe   :  { %502 = shalt.err (!%p499_p10)
}
  0xff   :  { %333 = dma.vmem_to_hbm [thread:$0]  %s328_s7, 256, %s597_s4, [#allocation9], %s520_s18, %s520_s18, %s521_s19  }
 0x100   :  { %515 = dma.done.wait [#allocation4], 256  }
 0x101   :  { %516 = vsyncadd [#allocation4], 4294967040 }
 0x102   :  { %517 = dma.done.wait [#allocation9], 512  }
 0x103   :  { %518 = vsyncadd [#allocation9], 4294966784 }
 0x104   :  { %343 = vsyncpa [#allocation3], 1 }
 0x105   :  { %344 = vsyncpa [#allocation6], 1 }
 0x106   :  { %345 = vsyncpa [#allocation4], 1 }
 0x107   :  { %346 = vsyncpa [#allocation9], 1 }

</bundles_post_ra>
